<compile_context>
chip_gen: v6e
topology: v6e:2x2x1
jax: 0.10.0
libtpu: 0.0.40
codegen_flags: <defaults>
</compile_context>

<pallas_src>
import functools

import jax
import jax.numpy as jnp
from jax.experimental import pallas as pl
from jax.experimental.pallas import tpu as pltpu


_K1 = 0x9E3779B1  # golden-ratio index multiplier
_K2 = 0x85EBCA77  # seed mixer
_M1 = 0x21F0AAAD  # 2-round finalizer constants
_M2 = 0xD35A2D97


def _dropout_kernel(seed_ref, x_ref, o_ref, *, thr_i32, inv_keep,
                    tile_rows, tile_cols, n_cols):
    """Elementwise dropout on one (tile_rows, tile_cols) tile."""
    i = pl.program_id(0)
    j = pl.program_id(1)
    shape = x_ref.shape  # (tile_rows, tile_cols)

    # Within-tile flat index (vector), plus tile offset / seed folded into a
    # single scalar:  (local + base)*K1 + seed*K2 == local*K1 + (base*K1 + seed*K2)
    rows = jax.lax.broadcasted_iota(jnp.int32, shape, 0)
    cols = jax.lax.broadcasted_iota(jnp.int32, shape, 1)
    local = (rows * n_cols + cols).astype(jnp.uint32)

    base = (i * tile_rows * n_cols + j * tile_cols).astype(jnp.uint32)
    seed = seed_ref[0].astype(jnp.uint32)
    mix = base * jnp.uint32(_K1) + seed * jnp.uint32(_K2)  # scalar-only math

    # 2-round xorshift-multiply hash (trimmed murmur finalizer).
    h = local * jnp.uint32(_K1) + mix
    h = h ^ (h >> 16)
    h = h * jnp.uint32(_M1)
    h = h ^ (h >> 15)
    h = h * jnp.uint32(_M2)

    # Single signed compare == unsigned(h) < round(keep_prob * 2^32).
    keep = pltpu.bitcast(h, jnp.int32) < jnp.int32(thr_i32)

    x = x_ref[...]
    # Scale in the input's native dtype (matches torch: dp has x's dtype).
    scaled = x * jnp.asarray(inv_keep, dtype=x.dtype)
    o_ref[...] = jnp.where(keep, scaled, jnp.zeros_like(scaled)).astype(o_ref.dtype)


def _budget():
    """(tile target bytes, scoped VMEM limit), generation-gated when queryable."""
    try:
        info = pltpu.get_tpu_info()
        vmem_cap = int(getattr(info, "vmem_capacity_bytes", 64 * 1024 * 1024))
    except Exception:
        vmem_cap = 64 * 1024 * 1024
    if vmem_cap >= 100 * 1024 * 1024:          # v5e / v6e: 128 MiB physical VMEM
        return 8 * 1024 * 1024, 48 * 1024 * 1024
    return 4 * 1024 * 1024, 32 * 1024 * 1024   # v7x: 64 MiB physical VMEM


def _choose_layout(shape, n_total):
    """Collapse to a 2-D (rows, cols) slab with lane-dense cols when possible."""
    ndim = len(shape)
    last = int(shape[-1]) if ndim else 1
    if ndim >= 2 and last % 128 == 0:
        return n_total // last, last
    for c in (1024, 512, 256, 128):            # lane-dense repack of the flat order
        if n_total % c == 0:
            return n_total // c, c
    if ndim >= 2:
        return n_total // last, last           # unaligned last dim (masked stores)
    return 1, n_total                          # tiny/odd 1-D fallback


def _pick_tiles(n_rows, n_cols, itemsize, target_bytes, row_align):
    row_bytes = max(1, n_cols * itemsize)
    if n_cols <= 128 or row_align * row_bytes <= target_bytes:
        # Full-width column tile; tile rows only.
        tc = n_cols
        if n_rows <= row_align:
            tm = n_rows
        else:
            tm_raw = max(row_align, target_bytes // row_bytes)
            tm = n_rows if tm_raw >= n_rows else max(row_align,
                                                     (tm_raw // row_align) * row_align)
    else:
        # Very wide rows: minimum sublane-aligned row count, tile columns.
        tm = n_rows if n_rows <= row_align else row_align
        tc_raw = max(128, (target_bytes // max(1, tm * itemsize)) // 128 * 128)
        tc = n_cols if tc_raw >= n_cols else tc_raw
    return tm, tc


def _ensure_multi_step(tm, tc, n_rows, n_cols, row_align):
    """Force >= 2 grid steps when possible (feeds both TCs on v7x)."""
    if pl.cdiv(n_rows, tm) * pl.cdiv(n_cols, tc) > 1:
        return tm, tc
    if n_rows > row_align:
        half = -(-n_rows // 2)
        tm2 = max(row_align, -(-half // row_align) * row_align)
        if tm2 < n_rows:
            return tm2, tc
    if n_cols > 128 and tc > 128:
        tc2 = max(128, ((tc // 2) // 128) * 128)
        if tc2 < n_cols:
            return tm, tc2
    return tm, tc


def dropout(x, *, p=0.5, seed=0, training=True, donate_input=False):
    """Pallas TPU implementation of the reference Dropout.forward."""
    if not training or p <= 0.0:
        return x
    keep_prob = 1.0 - float(p)
    if keep_prob <= 0.0:
        raise ValueError("p must be < 1 in training mode")

    orig_shape = x.shape
    n_total = 1
    for d in orig_shape:
        n_total *= int(d)
    if n_total == 0:
        return x

    n_rows, n_cols = _choose_layout(orig_shape, n_total)
    x2 = x.reshape(n_rows, n_cols)

    itemsize = x2.dtype.itemsize
    row_align = {1: 32, 2: 16}.get(itemsize, 8)
    target_bytes, vmem_limit = _budget()
    tm, tc = _pick_tiles(n_rows, n_cols, itemsize, target_bytes, row_align)
    tm, tc = _ensure_multi_step(tm, tc, n_rows, n_cols, row_align)
    grid = (pl.cdiv(n_rows, tm), pl.cdiv(n_cols, tc))

    # Signed threshold equivalent to an unsigned 32-bit compare against
    # round(keep_prob * 2^32).
    thr_i32 = int(round(keep_prob * 4294967296.0)) - 2147483648
    thr_i32 = max(-2147483648, min(2147483647, thr_i32))

    kernel = functools.partial(
        _dropout_kernel,
        thr_i32=thr_i32,
        inv_keep=1.0 / keep_prob,
        tile_rows=tm,
        tile_cols=tc,
        n_cols=n_cols,
    )

    seed_arr = jnp.asarray([seed], dtype=jnp.int32)

    out2 = pl.pallas_call(
        kernel,
        out_shape=jax.ShapeDtypeStruct((n_rows, n_cols), x2.dtype),
        grid_spec=pltpu.PrefetchScalarGridSpec(
            num_scalar_prefetch=1,
            grid=grid,
            in_specs=[pl.BlockSpec((tm, tc), lambda i, j, seed_ref: (i, j))],
            out_specs=pl.BlockSpec((tm, tc), lambda i, j, seed_ref: (i, j)),
        ),
        compiler_params=pltpu.CompilerParams(
            dimension_semantics=("parallel", "parallel"),
            vmem_limit_bytes=vmem_limit,
        ),
        input_output_aliases=({1: 0} if donate_input else {}),
    )(seed_arr, x2)

    return out2.reshape(orig_shape)


if __name__ == "__main__":
    key = jax.random.PRNGKey(0)
    k1, k2 = jax.random.split(key)

    p = 0.5
    keep_prob = 1.0 - p

    # Small MLP-style activation: batch=8, hidden=256.
    x = jax.random.normal(k1, (8, 256), dtype=jnp.float32)
    out = jax.block_until_ready(dropout(x, p=p, seed=1234, training=True))

    scaled = x / keep_prob
    is_zero = jnp.isclose(out, 0.0)
    is_scaled = jnp.isclose(out, scaled, rtol=1e-5, atol=1e-5)
    assert bool(jnp.all(is_zero | is_scaled)), "dropout output values invalid"
    frac_kept = float(jnp.mean(is_scaled & ~is_zero))
    assert 0.35 < frac_kept < 0.65, f"keep fraction {frac_kept} far from 0.5"

    # 1-D input exercises the lane-dense repack path.
    x1 = jax.random.normal(k2, (4096,), dtype=jnp.float32)
    out1 = jax.block_until_ready(dropout(x1, p=p, seed=7, training=True))
    scaled1 = x1 / keep_prob
    is_zero1 = jnp.isclose(out1, 0.0)
    is_scaled1 = jnp.isclose(out1, scaled1, rtol=1e-5, atol=1e-5)
    assert bool(jnp.all(is_zero1 | is_scaled1)), "1-D dropout output values invalid"
    frac1 = float(jnp.mean(is_scaled1 & ~is_zero1))
    assert 0.4 < frac1 < 0.6, f"1-D keep fraction {frac1} far from 0.5"

    # Eval mode is identity.
    out_eval = jax.block_until_ready(dropout(x, p=p, training=False))
    assert bool(jnp.all(out_eval == x))

    print("KERNEL_OK")
</pallas_src>

<mosaic_0001>
module attributes {stable_mosaic.version = 11 : i64} {
  func.func @_dropout_kernel(%arg0: i32, %arg1: i32, %arg2: memref<1xi32, #tpu.memory_space<smem>>, %arg3: memref<8x128xf32, #tpu.memory_space<vmem>>, %arg4: memref<8x128xf32, #tpu.memory_space<vmem>>) attributes {dimension_semantics = [#tpu.dimension_semantics<parallel>, #tpu.dimension_semantics<parallel>], iteration_bounds = array<i64: 1, 2>, scalar_prefetch = 1 : i64, scratch_operands = 0 : i64, tpu.core_type = #tpu.core_type<tc>, window_params = [{transform_indices = @transform_0, window_bounds = array<i64: 8, 128>}, {transform_indices = @transform_1, window_bounds = array<i64: 8, 128>}]} {
    %0 = tpu.iota {dimensions = array<i32: 0>} : vector<8x128xi32>
    %1 = tpu.iota {dimensions = array<i32: 1>} : vector<8x128xi32>
    %c256_i32 = arith.constant 256 : i32
    %2 = vector.broadcast %c256_i32 : i32 to vector<8x128xi32>
    %3 = arith.muli %0, %2 : vector<8x128xi32>
    %4 = arith.addi %3, %1 : vector<8x128xi32>
    %c8_i32 = arith.constant 8 : i32
    %5 = arith.muli %arg0, %c8_i32 : i32
    %c256_i32_0 = arith.constant 256 : i32
    %6 = arith.muli %5, %c256_i32_0 : i32
    %c128_i32 = arith.constant 128 : i32
    %7 = arith.muli %arg1, %c128_i32 : i32
    %8 = arith.addi %6, %7 : i32
    %c0 = arith.constant 0 : index
    %9 = memref.load %arg2[%c0] : memref<1xi32, #tpu.memory_space<smem>>
    %c-1640531535_i32 = arith.constant -1640531535 : i32
    %10 = arith.muli %8, %c-1640531535_i32 : i32
    %c-2048144777_i32 = arith.constant -2048144777 : i32
    %11 = arith.muli %9, %c-2048144777_i32 : i32
    %12 = arith.addi %10, %11 : i32
    %c-1640531535_i32_1 = arith.constant -1640531535 : i32
    %13 = vector.broadcast %c-1640531535_i32_1 : i32 to vector<8x128xi32>
    %14 = arith.muli %4, %13 : vector<8x128xi32>
    %15 = vector.broadcast %12 : i32 to vector<8x128xi32>
    %16 = arith.addi %14, %15 : vector<8x128xi32>
    %c16_i32 = arith.constant 16 : i32
    %17 = vector.broadcast %c16_i32 : i32 to vector<8x128xi32>
    %18 = arith.shrui %16, %17 : vector<8x128xi32>
    %19 = arith.xori %16, %18 : vector<8x128xi32>
    %c569420461_i32 = arith.constant 569420461 : i32
    %20 = vector.broadcast %c569420461_i32 : i32 to vector<8x128xi32>
    %21 = arith.muli %19, %20 : vector<8x128xi32>
    %c15_i32 = arith.constant 15 : i32
    %22 = vector.broadcast %c15_i32 : i32 to vector<8x128xi32>
    %23 = arith.shrui %21, %22 : vector<8x128xi32>
    %24 = arith.xori %21, %23 : vector<8x128xi32>
    %c-749064809_i32 = arith.constant -749064809 : i32
    %25 = vector.broadcast %c-749064809_i32 : i32 to vector<8x128xi32>
    %26 = arith.muli %24, %25 : vector<8x128xi32>
    %27 = tpu.bitcast %26 : vector<8x128xi32> -> vector<8x128xi32>
    %c0_i32 = arith.constant 0 : i32
    %28 = vector.broadcast %c0_i32 : i32 to vector<8x128xi32>
    %29 = arith.cmpi slt, %27, %28 : vector<8x128xi32>
    %c0_2 = arith.constant 0 : index
    %c0_3 = arith.constant 0 : index
    %30 = vector.load %arg3[%c0_2, %c0_3] : memref<8x128xf32, #tpu.memory_space<vmem>>, vector<8x128xf32>
    %cst = arith.constant 2.000000e+00 : f32
    %31 = vector.broadcast %cst : f32 to vector<8x128xf32>
    %32 = arith.mulf %30, %31 : vector<8x128xf32>
    %cst_4 = arith.constant 0.000000e+00 : f32
    %33 = vector.broadcast %cst_4 : f32 to vector<8x128xf32>
    %34 = arith.select %29, %32, %33 : vector<8x128xi1>, vector<8x128xf32>
    %c0_5 = arith.constant 0 : index
    %c0_6 = arith.constant 0 : index
    %35 = vector.load %arg4[%c0_5, %c0_6] : memref<8x128xf32, #tpu.memory_space<vmem>>, vector<8x128xf32>
    tpu.vector_store %arg4[%c0_5, %c0_6], %34 {strides = array<i32>} : memref<8x128xf32, #tpu.memory_space<vmem>>, vector<8x128xf32>,
    return
  }
  func.func @transform_0(%arg0: i32, %arg1: i32, %arg2: memref<1xi32, #tpu.memory_space<smem>>) -> (i32, i32) {
    %c0_i32 = arith.constant 0 : i32
    return %arg0, %arg1 : i32, i32
  }
  func.func @transform_1(%arg0: i32, %arg1: i32, %arg2: memref<1xi32, #tpu.memory_space<smem>>) -> (i32, i32) {
    %c0_i32 = arith.constant 0 : i32
    return %arg0, %arg1 : i32, i32
  }
}

</mosaic_0001>

<bundles_post_ra>
// kernel: tpu_custom_call.1
= control target key start
LH: loop header
LB: loop body
LE: loop exit
PB: predicated region body
PF: predicated region fallthrough
CT: control target
= control target key end

     0   :  { %s625_s0 = inlined_call_operand.<no memory space> [shape: s32[1], index: 0, kind: input, shape index: {}]   ;;  %s626_s1 = inlined_call_operand.hbm [shape: f32[8,256], index: 1, kind: input, shape index: {}]   ;;  %s627_s2 = inlined_call_operand.hbm [shape: f32[8,256], index: 2, kind: output, shape index: {}]  }
   0x1   :  { %7 = sst [smem:[#allocation3]] %s625_s0 }
   0x2   :  { %8 = vsyncpa [#allocation5], 0 }
   0x3   :  { %10 = vsyncpa [#allocation5 + $0x1], 0 }
   0x4   :  { %11 = vsyncpa [#allocation6], 0 }
   0x5   :  { %13 = vsyncpa [#allocation6 + $0x1], 0  ;;  %s484_s11 = smov 0   ;;  %s486_s12 = smov 0  }
   0x6   :  { %s488_s13 = smov 0   ;;  %s490_s14 = smov 0  }
   0x7   :  { %s492_s15 = smov 0   ;;  %s494_s16 = smov 0  }
   0x8 LB: > { %s277_s0 = sadd.s32 4294967295, %s462_s16   ;;  %s278_s17 = sadd.s32 4294967294, %s462_s16   ;;  %s462_s16 = sphi %s494_s16, %s19_s16   ;;  %s458_s15 = sphi %s492_s15, %s639_s15   ;;  %s454_s14 = sphi %s490_s14, %s638_s14   ;;  %s450_s13 = sphi %s488_s13, %s637_s13   ;;  %s446_s12 = sphi %s486_s12, %s636_s12   ;;  %s442_s11 = sphi %s484_s11, %s635_s11  }
   0x9   : > { %s28_s18 = sadd.s32 1, %s458_s15  ;;  %s40_s19 = sadd.s32 1, %s450_s13 }
   0xa   : > { %p29_p0 = scmp.ge.s32.totalorder %s28_s18, 2  ;;  %p47_p1 = scmp.ne.s32.totalorder %s450_s13, %s446_s12 }
   0xb   : > { %p48_p2 = scmp.eq.s32.totalorder %s462_s16, 0  ;;  %p53_p3 = scmp.ne.s32.totalorder %s446_s12, %s442_s11 }
   0xc   : > { %s641_s18 = smov (%p29_p0, %s28_s18), 0  ;;  %p54_p5 = scmp.eq.s32.totalorder %s277_s0, 0 }
   0xd   : > { %p525_p4 = por %p48_p2, %p47_p1  ;;  %s36_s21 = ssub.s32 %s458_s15, %s641_s18 }
   0xe   : > { %p79_p6 = scmp.eq.s32.totalorder %s277_s0, 1  ;;  %p38_p7 = scmp.eq.s32.totalorder %s36_s21, 0 }
   0xf   : > { %p531_p8 = por %p54_p5, %p53_p3  ;;  %p85_p10 = scmp.eq.s32.totalorder %s278_s17, 1 }
  0x10   : > { %p535_p9 = por %p79_p6, %p47_p1  ;;  %p304_p13 = scmp.lt.s32.totalorder %s462_s16, 2 }
  0x11   : > { %s540_s24 = scalar_select %p38_p7, %s450_s13, %s40_s19  }
  0x12   : > { %p542_p11 = por %p85_p10, %p53_p3  ;;  %s105_s26 = sand.u32 1, %s450_s13  }
  0x13   : > { %s281_s27 = sshll.u32 %s105_s26, 3  ;;  %s282_s28 = sshll.u32 %s458_s15, 7 }
  0x14   : > { %s631_s25 = scalar_select %p542_p11, 1, 0 }
  0x15   : > { %s116_s3 = scalar_lea.hbm %s626_s1, %s282_s28  ;;  %s109_s4 = scalar_lea.vmem [#allocation4], %s281_s27 }
  0x16   : > { %s118_s5 = sshll.u32 %s109_s4, 4  ;;  %p555_p0 = pnand %p304_p13, %p525_p4  ;;  %s119_s5 = int_to_ptr.vmem [resolvable:$true] %s118_s5 }
  0x17   : > { %p283_p1 = scmp.ge.s32.totalorder %s462_s16, 1  ;;  %p123_p2 = scmp.lt.s32.totalorder %s462_s16, 3 }
  0x18   : > { %s106_s7 = scalar_lea.sflag [#allocation5], %s105_s26  ;;  %p356_p3 = pneg %p555_p0 }
  0x19   : > { %s367_s8 = scalar_lea.vmem %s119_s5, 128  ;;  %s464_s9 = smov [#allocation4]  }
  0x1a   : > { %p368_p5 = scmp.ne.s32.totalorder %s119_s5, %s367_s8  ;;  %s372_s10 = sshll.u32 %s464_s9, 4  ;;  %s373_s10 = int_to_ptr.vmem [resolvable:$false] %s372_s10 }
  0x1b   : > { %s374_s0 = scalar_lea.vmem %s373_s10, 256  ;;  %p375_p10 = scmp.lt.s32.totalorder %s119_s5, %s373_s10 }
  0x1c   : > { %p370_p6 = pnand %p368_p5, %p356_p3  ;;  %p376_p12 = scmp.lt.s32.totalorder %s374_s0, %s367_s8 }
  0x1e   : > { %p371_p7 = pneg %p370_p6  ;;  %p377_p4 = por %p376_p12, %p375_p10 }
  0x20   : > { %p378_p13 = pnand %p377_p4, %p371_p7 }
  0x22   : > { %381 = shalt.err (!%p378_p13)
}
  0x23   : > { %299 = dma.hbm_to_vmem [thread:$0]  (!%p555_p0), %s116_s3, 128, %s119_s5, %s106_s7  }
  0x24   : > { %p124_p11 = pnand %p283_p1, %p123_p2 }
  0x25   : > { %s570_s17 = sand.u32 (!%p124_p11), 1, %s446_s12  }
  0x26   : > { %127 = sbr.rel (%p124_p11) target bundleno = 83 (0x53), region = 24  ;;  %s284_s19 = sshll.u32 (!%p124_p11), %s570_s17, 3 }
  0x27   : > { %s130_s20 = scalar_lea.sflag (!%p124_p11), [#allocation5], %s570_s17  ;;  %s133_s21 = scalar_lea.vmem (!%p124_p11), [#allocation4], %s284_s19 }
  0x2b   : > { %433 = dma.done.wait (%p531_p8), %s130_s20, 128  }
  0x2c   : > { %435 = vsyncadd (%p531_p8), %s130_s20, 4294967168  ;;  %v152_v0 = vlaneseq  ;;  %s161_s26 = sld [smem:[#allocation3]]  ;;  %s287_s27 = smul.u32 465361024, %s454_s14  ;;  %v175_v12 = vld [vmem:[%s133_s21] sm:$0xff] }
  0x2d   : > { %s151_s22 = scalar_lea.vmem [#allocation7], %s284_s19  ;;  %v176_v14 = vmul.f32 2.0, %v175_v12  ;;  %s289_s3 = sshll.u32 %s454_s14, 7 }
  0x2e   : > { %v153_v1 = vshrl.u32 %v152_v0, 7  ;;  %v155_v2 = vand.u32 127, %v152_v0  ;;  %s195_s30 = sshll.u32 %s151_s22, 4  ;;  %s193_s6 = scalar_lea.hbm %s627_s2, %s289_s3  ;;  %s580_s30 = int_to_ptr.vmem [resolvable:$true] %s195_s30 }
  0x2f   : > { %s180_s7 = scalar_lea.sflag [#allocation6], %s570_s17  ;;  %s382_s8 = scalar_lea.vmem %s580_s30, 128 }
  0x30   : > { %v156_v3 = vmul.u32 256, %v153_v1  ;;  %p383_p8 = scmp.ne.s32.totalorder %s580_s30, %s382_s8  ;;  %s465_s14 = smov [#allocation7]  }
  0x31   : > { %s386_s9 = sshll.u32 %s465_s14, 4  ;;  %s387_s9 = int_to_ptr.vmem [resolvable:$false] %s386_s9 }
  0x32   : > { %v157_v4 = vadd.s32 %v156_v3, %v155_v2  ;;  %s163_s28 = smul.u32 2246822519, %s161_s26  ;;  %p384_p11 = pnand %p383_p8, %p535_p9 }
  0x33   : > { %s388_s10 = scalar_lea.vmem %s387_s9, 256  ;;  %p389_p0 = scmp.lt.s32.totalorder %s580_s30, %s387_s9 }
  0x34   : > { %v165_v5 = vmul.u32 2654435761, %v157_v4  ;;  %s164_s29 = sadd.s32 %s287_s27, %s163_s28  ;;  %p385_p12 = pneg %p384_p11 }
  0x35   : > { %v166_v6 = vstv %s164_s29  ;;  %p390_p1 = scmp.lt.s32.totalorder %s388_s10, %s382_s8 }
  0x36   : > { %v167_v7 = vadd.s32 %v166_v6, %v165_v5 }
  0x37   : > { %p391_p2 = por %p390_p1, %p389_p0 }
  0x38   : > { %v168_v8 = vshrl.u32 %v167_v7, 16 }
  0x39   : > { %p392_p3 = pnand %p391_p2, %p385_p12 }
  0x3a   : > { %v169_v9 = vxor.u32 %v168_v8, %v167_v7 }
  0x3c   : > { %v170_v10 = vmul.u32 569420461, %v169_v9 }
  0x3e   : > { %v171_v11 = vshrl.u32 %v170_v10, 15 }
  0x40   : > { %v172_v13 = vxor.u32 %v171_v11, %v170_v10 }
  0x42   : > { %v173_v15 = vmul.u32 3545902487, %v172_v13 }
  0x44   : > { %vm174_vm0 = vcmp.lt.s32.totalorder %v173_v15, 0 }
  0x45   : > { %v177_v16 = vsel %vm174_vm0, %v176_v14, 0.0 }
  0x46   : > { %178 = vst [vmem:[%s151_s22] sm:$0xff] %v177_v16 }
  0x47   : > { %395 = shalt.err (!%p392_p3)
}
  0x48   : > { %s396_s0 = scalar_lea.hbm %s193_s6, 128  ;;  %s400_s20 = scalar_lea.hbm %s627_s2, 256 }
  0x49   : > { %p397_p5 = scmp.ne.s32.totalorder %s193_s6, %s396_s0  ;;  %p401_p10 = scmp.lt.s32.totalorder %s193_s6, %s627_s2 }
  0x4a   : > { %p402_p4 = scmp.lt.s32.totalorder %s400_s20, %s396_s0 }
  0x4b   : > { %p398_p6 = pnand %p397_p5, %p535_p9 }
  0x4c   : > { %p403_p13 = por %p402_p4, %p401_p10 }
  0x4d   : > { %p399_p7 = pneg %p398_p6 }
  0x4f   : > { %p404_p8 = pnand %p403_p13, %p399_p7 }
  0x51   : > { %407 = shalt.err (!%p404_p8)
}
  0x52   : > { %294 = dma.vmem_to_hbm [thread:$0]  (%p535_p9), %s580_s30, 128, %s193_s6, %s180_s7  }
  0x53 PF: > { %s207_s27 = sand.u32 1, %s442_s11   ;;  %p633_p11 = scmp.ne.s32.totalorder %s631_s25, 0 }
  0x54   : > { %p634_p12 = scmp.ge.s32.totalorder %s462_s16, 2  ;;  %s208_s28 = scalar_lea.sflag [#allocation6], %s207_s27 }
  0x56   : > { %p301_p0 = pnand %p634_p12, %p633_p11 }
  0x58   : > { %p302_p1 = pneg %p301_p0 }
  0x5a   : > { %437 = dma.done.wait (%p302_p1), %s208_s28, 128  }
  0x5b   : > { %439 = vsyncadd (%p302_p1), %s208_s28, 4294967168  ;;  %s19_s16 = sadd.s32 1, %s462_s16   ;;  %s635_s11 = smov %s446_s12 }
  0x5c   : > { %p16_p2 = scmp.ge.s32.totalorder %s19_s16, 4   ;;  %s636_s12 = smov %s450_s13 }
  0x5d   : > { %s637_s13 = smov %s540_s24  ;;  %s638_s14 = smov %s458_s15 }
  0x5e   : > { %s639_s15 = smov %s641_s18  ;;  %18 = sbr.rel (!%p16_p2) target bundleno = 8 (0x8), region = 69 }
  0x63   :  { %213 = vsyncpa [#allocation5], 1 }
  0x64   :  { %215 = vsyncpa [#allocation5 + $0x1], 1 }
  0x65   :  { %216 = vsyncpa [#allocation6], 1 }
  0x66   :  { %218 = vsyncpa [#allocation6 + $0x1], 1 }

</bundles_post_ra>
